<compile_context>
chip_gen: v5e
topology: v5e:2x2
jax: 0.10.0
libtpu: 0.0.40
codegen_flags: <defaults>
</compile_context>

<pallas_src>
import functools
from typing import NamedTuple

import jax
import jax.numpy as jnp
from jax.experimental import pallas as pl
from jax.experimental.pallas import tpu as pltpu

_MiB = 1 << 20
_FEAT_RESIDENT_BUDGET = 8 * _MiB    # double-buffered bf16 feature matrix
_VMEM_LIMIT_CAP = 30 * _MiB         # < v7x 64 MiB physical, < v5e 128 MiB physical


def _round_up(x, m):
    return ((x + m - 1) // m) * m


def _largest_divisor(n, cap, align):
    """Largest multiple of `align` that divides n and is <= cap (align | n)."""
    best = align
    d = align
    cap = min(cap, n)
    while d <= cap:
        if n % d == 0:
            best = d
        d += align
    return best


def _pad2(a, rows, cols):
    pr, pc = rows - a.shape[0], cols - a.shape[1]
    if pr or pc:
        a = jnp.pad(a, ((0, pr), (0, pc)))
    return a


# --------------------------------------------------------------------------
# Adjacency preparation (cacheable across layers / calls)
# --------------------------------------------------------------------------
class PreparedAdjacency(NamedTuple):
    adj: jax.Array      # (n_pad, n_pad) int8, exact 0/1
    n: int
    n_pad: int
    tm: int             # dst-node tile (sublane dim)
    tk: int             # src-node tile (lane dim of A)
    nz: jax.Array       # (gi*gk,) int32 nonzero-tile flags
    fetch_i: jax.Array  # (gi*gk,) int32 adjacency block-row to fetch
    fetch_k: jax.Array  # (gi*gk,) int32 adjacency block-col to fetch


def prepare_adjacency(adj, *, skip_empty_tiles=True,
                      tm_target=512, tk_target=2048):
    """Pad to tile-divisible (8,128) shape, cast 0/1 adjacency to int8 and
    precompute the per-tile nonzero / DMA-dedup maps.  Call once per graph and
    reuse across GraphConv layers to amortize the pad/cast/scan passes."""
    n = adj.shape[0]
    n_pad = _round_up(n, 128)               # light padding only (<=128 rows waste)

    # dst tile: keep >=2 (ideally >=4) dst tiles so v7x's two TensorCores both
    # get work on the "parallel" axis; src tile: large lane-dim DMAs.
    tm_cap = tm_target
    if n_pad >= 4 * 256:
        tm_cap = min(tm_cap, n_pad // 4)
    elif n_pad >= 256:
        tm_cap = min(tm_cap, n_pad // 2)
    tm = _largest_divisor(n_pad, cap=tm_cap, align=8)
    tk = _largest_divisor(n_pad, cap=tk_target, align=128)

    # 0/1 adjacency -> int8 is lossless and quarters the dominant N^2 HBM
    # stream; the kernel upcasts each tile to bf16 on the VPU before the dot.
    adj_i8 = _pad2(adj, n_pad, n_pad).astype(jnp.int8)

    gi, gk = n_pad // tm, n_pad // tk
    t = jnp.arange(gi * gk, dtype=jnp.int32)
    if skip_empty_tiles:
        nz = (adj_i8.reshape(gi, tm, gk, tk) != 0).any(axis=(1, 3))
        nz = nz.reshape(-1).astype(jnp.int32)
        # For an all-zero tile re-fetch the previously fetched block, so the
        # pipeline issues no new adjacency DMA (compute is pl.when-guarded).
        idx_if_nz = jnp.where(nz == 1, t, -1)
        last_nz = jax.lax.cummax(idx_if_nz, axis=0)
        fetch = jnp.where(last_nz >= 0, last_nz, t)
    else:
        nz = jnp.ones((gi * gk,), jnp.int32)
        fetch = t
    fetch_i = (fetch // gk).astype(jnp.int32)
    fetch_k = (fetch % gk).astype(jnp.int32)
    return PreparedAdjacency(adj_i8, n, n_pad, tm, tk, nz, fetch_i, fetch_k)


# --------------------------------------------------------------------------
# Kernels
# --------------------------------------------------------------------------
def _agg_transform_kernel(nz_ref, fi_ref, fk_ref,
                          adj_ref, x_ref, w_ref, b_ref, out_ref, acc_ref,
                          *, tk, num_k, resident_x):
    """in_feats <= out_feats path: acc += A@X over k; epilogue (acc@W) + b."""
    del fi_ref, fk_ref
    i = pl.program_id(0)
    k = pl.program_id(1)

    @pl.when(k == 0)
    def _():
        acc_ref[...] = jnp.zeros_like(acc_ref)

    @pl.when(nz_ref[i * num_k + k] == 1)
    def _():
        a = adj_ref[...].astype(jnp.bfloat16)          # int8 -> bf16 (VPU)
        if resident_x:
            x = x_ref[pl.ds(pl.multiple_of(k * tk, tk), tk), :]
        else:
            x = x_ref[...]
        acc_ref[...] += jnp.dot(a, x, preferred_element_type=jnp.float32)

    @pl.when(k == num_k - 1)
    def _():
        out = jnp.dot(acc_ref[...].astype(jnp.bfloat16), w_ref[...],
                      preferred_element_type=jnp.float32) + b_ref[...]
        out_ref[...] = out.astype(out_ref.dtype)


def _agg_bias_kernel(nz_ref, fi_ref, fk_ref,
                     adj_ref, xw_ref, b_ref, out_ref, acc_ref,
                     *, tk, num_k, resident_x):
    """in_feats > out_feats path: acc += A@(XW) over k; epilogue + bias."""
    del fi_ref, fk_ref
    i = pl.program_id(0)
    k = pl.program_id(1)

    @pl.when(k == 0)
    def _():
        acc_ref[...] = jnp.zeros_like(acc_ref)

    @pl.when(nz_ref[i * num_k + k] == 1)
    def _():
        a = adj_ref[...].astype(jnp.bfloat16)
        if resident_x:
            x = xw_ref[pl.ds(pl.multiple_of(k * tk, tk), tk), :]
        else:
            x = xw_ref[...]
        acc_ref[...] += jnp.dot(a, x, preferred_element_type=jnp.float32)

    @pl.when(k == num_k - 1)
    def _():
        out_ref[...] = (acc_ref[...] + b_ref[...]).astype(out_ref.dtype)


def _feat_transform_kernel(x_ref, w_ref, out_ref):
    """XW = X @ W (bf16 operands, f32 accumulate), cast to compute dtype."""
    out_ref[...] = jnp.dot(x_ref[...], w_ref[...],
                           preferred_element_type=jnp.float32
                           ).astype(out_ref.dtype)


# --------------------------------------------------------------------------
# pallas_call wrappers
# --------------------------------------------------------------------------
def _feat_transform(feat_p, weight_p, out_dtype):
    n_rows, fi_pad = feat_p.shape
    fo_pad = weight_p.shape[1]
    tr = _largest_divisor(n_rows, cap=512, align=8)
    grid = (n_rows // tr,)
    return pl.pallas_call(
        _feat_transform_kernel,
        out_shape=jax.ShapeDtypeStruct((n_rows, fo_pad), out_dtype),
        grid_spec=pl.GridSpec(
            grid=grid,
            in_specs=[pl.BlockSpec((tr, fi_pad), lambda i: (i, 0)),
                      pl.BlockSpec((fi_pad, fo_pad), lambda i: (0, 0))],
            out_specs=pl.BlockSpec((tr, fo_pad), lambda i: (i, 0)),
        ),
        compiler_params=pltpu.CompilerParams(
            dimension_semantics=("parallel",)),
        cost_estimate=pl.CostEstimate(
            flops=int(2 * n_rows * fi_pad * fo_pad),
            transcendentals=0,
            bytes_accessed=int(feat_p.size * 2 + weight_p.size * 2
                               + n_rows * fo_pad
                               * jnp.dtype(out_dtype).itemsize)),
    )(feat_p, weight_p)


def _aggregate(prep: PreparedAdjacency, src_p, bias_p, weight_p):
    n_pad, tm, tk = prep.n_pad, prep.tm, prep.tk
    f_src = src_p.shape[1]
    fo_pad = bias_p.shape[1]
    gi, gk = n_pad // tm, n_pad // tk

    # Keep the streamed feature matrix fully VMEM-resident when it fits, so it
    # is fetched once instead of (n_pad/tm) times.
    feat_resident_bytes = 2 * n_pad * f_src * 2        # 2 pipeline bufs, bf16
    resident_x = feat_resident_bytes <= _FEAT_RESIDENT_BUDGET

    acc_cols = f_src if weight_p is not None else fo_pad
    vmem_bytes = (2 * tm * tk * 1                                     # adj int8
                  + (feat_resident_bytes if resident_x else 2 * tk * f_src * 2)
                  + (2 * weight_p.size * 2 if weight_p is not None else 0)
                  + 2 * fo_pad * 4                                    # bias
                  + tm * acc_cols * 4                                 # accumulator
                  + 2 * tm * fo_pad * 4)                              # out tile
    # Explicit limit: v5e's default scoped VMEM is only 16 MiB; leave headroom
    # for Mosaic internal scratch and stay well under v7x's 64 MiB physical.
    vmem_limit = int(min(max(vmem_bytes + 6 * _MiB, 16 * _MiB), _VMEM_LIMIT_CAP))

    adj_spec = pl.BlockSpec(
        (tm, tk),
        lambda i, k, nz, fi, fk: (fi[i * gk + k], fk[i * gk + k]))
    if resident_x:
        x_spec = pl.BlockSpec((n_pad, f_src), lambda i, k, nz, fi, fk: (0, 0))
    else:
        # Empty-tile remap dedups the streamed feature DMA as well.
        x_spec = pl.BlockSpec((tk, f_src),
                              lambda i, k, nz, fi, fk: (fk[i * gk + k], 0))

    in_specs = [adj_spec, x_spec]
    operands = [prep.adj, src_p]
    if weight_p is not None:
        in_specs.append(pl.BlockSpec(weight_p.shape,
                                     lambda i, k, nz, fi, fk: (0, 0)))
        operands.append(weight_p)
        kernel = functools.partial(_agg_transform_kernel, tk=tk, num_k=gk,
                                   resident_x=resident_x)
        extra_flops = 2 * n_pad * weight_p.shape[0] * weight_p.shape[1]
        w_bytes = weight_p.size * 2
    else:
        kernel = functools.partial(_agg_bias_kernel, tk=tk, num_k=gk,
                                   resident_x=resident_x)
        extra_flops = 0
        w_bytes = 0
    in_specs.append(pl.BlockSpec((1, fo_pad), lambda i, k, nz, fi, fk: (0, 0)))
    operands.append(bias_p)

    flops = 2 * n_pad * n_pad * f_src + extra_flops      # dense upper bound
    feat_reads = 1 if resident_x else gi
    bytes_accessed = (prep.adj.size                       # int8
                      + feat_reads * src_p.size * 2
                      + w_bytes + bias_p.size * 4 + n_pad * fo_pad * 4)

    # TODO(synk): pipeline_mode=pl.Buffered(3) on adj_spec once xprof shows
    # exposed HBM latency (only ~5% once no longer overhead-bound).
    return pl.pallas_call(
        kernel,
        out_shape=jax.ShapeDtypeStruct((n_pad, fo_pad), jnp.float32),
        grid_spec=pltpu.PrefetchScalarGridSpec(
            num_scalar_prefetch=3,
            grid=(gi, gk),
            in_specs=in_specs,
            out_specs=pl.BlockSpec((tm, fo_pad),
                                   lambda i, k, nz, fi, fk: (i, 0)),
            scratch_shapes=[pltpu.VMEM((tm, acc_cols), jnp.float32)],
        ),
        compiler_params=pltpu.CompilerParams(
            dimension_semantics=("parallel", "arbitrary"),
            vmem_limit_bytes=vmem_limit),
        cost_estimate=pl.CostEstimate(
            flops=int(flops), transcendentals=0,
            bytes_accessed=int(bytes_accessed)),
    )(prep.nz, prep.fetch_i, prep.fetch_k, *operands)


def graph_conv(adj, feat, weight, bias, *, skip_empty_tiles=True,
               compute_dtype=jnp.bfloat16):
    """GraphConv forward (norm='none', activation=None, weight=True, bias=True).

    adj    : (N, N) float dense adjacency with adj[dst, src] = 1 for edge
             src->dst, OR a PreparedAdjacency (reuse across layers).
    feat   : (N, in_feats) float32
    weight : (in_feats, out_feats) float32
    bias   : (out_feats,) float32
    returns: (N, out_feats) float32
    """
    prep = adj if isinstance(adj, PreparedAdjacency) else \
        prepare_adjacency(adj, skip_empty_tiles=skip_empty_tiles)
    n, in_feats = feat.shape
    assert prep.n == n, "feature rows must match adjacency size"
    out_feats = weight.shape[1]
    n_pad = prep.n_pad

    # Full-width MXU when the real feature dim is >= 256; lane-dense otherwise.
    def _fdim_pad(f):
        return _round_up(f, 256) if f >= 256 else _round_up(f, 128)

    fi_pad = _fdim_pad(in_feats)
    fo_pad = _fdim_pad(out_feats)

    w_p = _pad2(weight, fi_pad, fo_pad).astype(compute_dtype)
    b_p = jnp.pad(bias.astype(jnp.float32),
                  (0, fo_pad - out_feats)).reshape(1, fo_pad)
    feat_p = _pad2(feat, n_pad, fi_pad).astype(compute_dtype)

    if in_feats > out_feats:
        # DGL path: transform first (cheaper), then aggregate: A @ (X W) + b.
        xw = _feat_transform(feat_p, w_p, compute_dtype)   # (n_pad, fo_pad)
        out_p = _aggregate(prep, xw, b_p, None)
    else:
        # DGL path: aggregate first, transform in epilogue: (A @ X) W + b.
        out_p = _aggregate(prep, feat_p, b_p, w_p)

    return out_p[:n, :out_feats]


# TODO(synk): norm in {'both','left','right'} (degree scaling), optional
# activation, edge_weight, and the zero-in-degree runtime check are not
# exercised by the module defaults and are omitted here.


if __name__ == "__main__":
    key = jax.random.PRNGKey(0)
    k_adj, k_f1, k_w1, k_f2, k_w2 = jax.random.split(key, 5)

    num_nodes = 16
    hi = jax.lax.Precision.HIGHEST

    def bfr(x):      # round to bf16 and back (mirrors kernel compute dtype)
        return x.astype(jnp.bfloat16).astype(jnp.float32)

    # Deterministic random graph with self-loops (no zero in-degree nodes).
    adj = (jax.random.uniform(k_adj, (num_nodes, num_nodes)) < 0.3
           ).astype(jnp.float32)
    adj = jnp.maximum(adj, jnp.eye(num_nodes, dtype=jnp.float32))

    # Prepare once (padded int8 adjacency + tile-sparsity map), reuse twice.
    prep = prepare_adjacency(adj)

    # --- path 1: in_feats <= out_feats  (aggregate, then transform) --------
    in1, out1 = 8, 32
    feat1 = jax.random.normal(k_f1, (num_nodes, in1), dtype=jnp.float32)
    # kaiming_normal_ on Tensor(in_feats, out_feats): fan_in=out_feats, gain=√2
    w1 = (2.0 / out1) ** 0.5 * jax.random.normal(k_w1, (in1, out1),
                                                 dtype=jnp.float32)
    b1 = jnp.zeros((out1,), jnp.float32)          # init.zeros_(bias)

    y1 = jax.block_until_ready(graph_conv(prep, feat1, w1, b1))

    agg1 = jnp.matmul(adj, bfr(feat1), precision=hi)
    ref1 = jnp.matmul(bfr(agg1), bfr(w1), precision=hi) + b1
    assert y1.shape == (num_nodes, out1)
    assert jnp.allclose(y1, ref1, atol=3e-2, rtol=3e-2), \
        float(jnp.max(jnp.abs(y1 - ref1)))

    # --- path 2: in_feats > out_feats  (transform, then aggregate) ---------
    in2, out2 = 64, 16
    feat2 = jax.random.normal(k_f2, (num_nodes, in2), dtype=jnp.float32)
    w2 = (2.0 / out2) ** 0.5 * jax.random.normal(k_w2, (in2, out2),
                                                 dtype=jnp.float32)
    b2 = 0.1 * jnp.ones((out2,), jnp.float32)     # non-zero to exercise bias

    y2 = jax.block_until_ready(graph_conv(prep, feat2, w2, b2))

    xw2 = bfr(jnp.matmul(bfr(feat2), bfr(w2), precision=hi))
    ref2 = jnp.matmul(adj, xw2, precision=hi) + b2
    assert y2.shape == (num_nodes, out2)
    assert jnp.allclose(y2, ref2, atol=3e-2, rtol=3e-2), \
        float(jnp.max(jnp.abs(y2 - ref2)))

    print("KERNEL_OK")
</pallas_src>

<mosaic_0001>
module attributes {stable_mosaic.version = 11 : i64} {
  func.func @_agg_transform_kernel(%arg0: i32, %arg1: i32, %arg2: memref<1xi32, #tpu.memory_space<smem>>, %arg3: memref<1xi32, #tpu.memory_space<smem>>, %arg4: memref<1xi32, #tpu.memory_space<smem>>, %arg5: memref<128x128xi8, #tpu.memory_space<vmem>>, %arg6: memref<128x128xbf16, #tpu.memory_space<vmem>>, %arg7: memref<128x128xbf16, #tpu.memory_space<vmem>>, %arg8: memref<1x128xf32, #tpu.memory_space<vmem>>, %arg9: memref<128x128xf32, #tpu.memory_space<vmem>>, %arg10: memref<128x128xf32, #tpu.memory_space<vmem>>) attributes {dimension_semantics = [#tpu.dimension_semantics<parallel>, #tpu.dimension_semantics<arbitrary>], iteration_bounds = array<i64: 1, 1>, scalar_prefetch = 3 : i64, scratch_operands = 1 : i64, tpu.core_type = #tpu.core_type<tc>, window_params = [{transform_indices = @transform_0, window_bounds = array<i64: 128, 128>}, {pipeline_mode = #tpu.pipeline_mode<synchronous>, transform_indices = @transform_1, window_bounds = array<i64: 128, 128>}, {pipeline_mode = #tpu.pipeline_mode<synchronous>, transform_indices = @transform_2, window_bounds = array<i64: 128, 128>}, {pipeline_mode = #tpu.pipeline_mode<synchronous>, transform_indices = @transform_3, window_bounds = array<i64: 1, 128>}, {transform_indices = @transform_4, window_bounds = array<i64: 128, 128>}]} {
    %c0_i32 = arith.constant 0 : i32
    %0 = arith.cmpi eq, %arg1, %c0_i32 : i32
    %1 = arith.extui %0 : i1 to i32
    %c0_i32_0 = arith.constant 0 : i32
    %2 = arith.cmpi ne, %1, %c0_i32_0 : i32
    scf.if %2 {
      %cst = arith.constant 0.000000e+00 : f32
      %13 = vector.broadcast %cst : f32 to vector<128x128xf32>
      %c0 = arith.constant 0 : index
      %c0_5 = arith.constant 0 : index
      %14 = vector.load %arg10[%c0, %c0_5] : memref<128x128xf32, #tpu.memory_space<vmem>>, vector<128x128xf32>
      tpu.vector_store %arg10[%c0, %c0_5], %13 {strides = array<i32>} : memref<128x128xf32, #tpu.memory_space<vmem>>, vector<128x128xf32>,
    } else {
    }
    %c1_i32 = arith.constant 1 : i32
    %3 = arith.muli %arg0, %c1_i32 : i32
    %4 = arith.addi %3, %arg1 : i32
    %5 = arith.index_cast %4 : i32 to index
    %6 = memref.load %arg2[%5] : memref<1xi32, #tpu.memory_space<smem>>
    %c1_i32_1 = arith.constant 1 : i32
    %7 = arith.cmpi eq, %6, %c1_i32_1 : i32
    %8 = arith.extui %7 : i1 to i32
    %c0_i32_2 = arith.constant 0 : i32
    %9 = arith.cmpi ne, %8, %c0_i32_2 : i32
    scf.if %9 {
      %c0 = arith.constant 0 : index
      %c0_5 = arith.constant 0 : index
      %13 = vector.load %arg5[%c0, %c0_5] : memref<128x128xi8, #tpu.memory_space<vmem>>, vector<128x128xi8>
      %14 = arith.sitofp %13 : vector<128x128xi8> to vector<128x128xbf16>
      %c128_i32 = arith.constant 128 : i32
      %15 = arith.muli %arg1, %c128_i32 : i32
      %16 = tpu.assume_multiple %15, 128 : i32
      %17 = arith.index_cast %16 : i32 to index
      %c0_6 = arith.constant 0 : index
      %18 = vector.load %arg6[%17, %c0_6] : memref<128x128xbf16, #tpu.memory_space<vmem>>, vector<128x128xbf16>
      %c0_7 = arith.constant 0 : index
      %c0_8 = arith.constant 0 : index
      %19 = vector.load %arg10[%c0_7, %c0_8] : memref<128x128xf32, #tpu.memory_space<vmem>>, vector<128x128xf32>
      %cst = arith.constant dense<0.000000e+00> : vector<128x128xf32>
      %20 = tpu.matmul %14, %18, %cst {dimension_numbers = #tpu.dot_dimension_numbers<[1], [0], [0], [1], [0, 0, 1, 1], [], []>} : vector<128x128xbf16>, vector<128x128xbf16>, vector<128x128xf32> -> vector<128x128xf32>
      %21 = arith.addf %19, %20 : vector<128x128xf32>
      %c0_9 = arith.constant 0 : index
      %c0_10 = arith.constant 0 : index
      %22 = vector.load %arg10[%c0_9, %c0_10] : memref<128x128xf32, #tpu.memory_space<vmem>>, vector<128x128xf32>
      tpu.vector_store %arg10[%c0_9, %c0_10], %21 {strides = array<i32>} : memref<128x128xf32, #tpu.memory_space<vmem>>, vector<128x128xf32>,
    } else {
    }
    %c0_i32_3 = arith.constant 0 : i32
    %10 = arith.cmpi eq, %arg1, %c0_i32_3 : i32
    %11 = arith.extui %10 : i1 to i32
    %c0_i32_4 = arith.constant 0 : i32
    %12 = arith.cmpi ne, %11, %c0_i32_4 : i32
    scf.if %12 {
      %c0 = arith.constant 0 : index
      %c0_5 = arith.constant 0 : index
      %13 = vector.load %arg10[%c0, %c0_5] : memref<128x128xf32, #tpu.memory_space<vmem>>, vector<128x128xf32>
      %14 = arith.truncf %13 : vector<128x128xf32> to vector<128x128xbf16>
      %c0_6 = arith.constant 0 : index
      %c0_7 = arith.constant 0 : index
      %15 = vector.load %arg7[%c0_6, %c0_7] : memref<128x128xbf16, #tpu.memory_space<vmem>>, vector<128x128xbf16>
      %cst = arith.constant dense<0.000000e+00> : vector<128x128xf32>
      %16 = tpu.matmul %14, %15, %cst {dimension_numbers = #tpu.dot_dimension_numbers<[1], [0], [0], [1], [0, 0, 1, 1], [], []>} : vector<128x128xbf16>, vector<128x128xbf16>, vector<128x128xf32> -> vector<128x128xf32>
      %c0_8 = arith.constant 0 : index
      %c0_9 = arith.constant 0 : index
      %17 = vector.load %arg8[%c0_8, %c0_9] : memref<1x128xf32, #tpu.memory_space<vmem>>, vector<1x128xf32>
      %18 = vector.broadcast %17 : vector<1x128xf32> to vector<128x128xf32>
      %19 = arith.addf %16, %18 : vector<128x128xf32>
      %c0_10 = arith.constant 0 : index
      %c0_11 = arith.constant 0 : index
      %20 = vector.load %arg9[%c0_10, %c0_11] : memref<128x128xf32, #tpu.memory_space<vmem>>, vector<128x128xf32>
      tpu.vector_store %arg9[%c0_10, %c0_11], %19 {strides = array<i32>} : memref<128x128xf32, #tpu.memory_space<vmem>>, vector<128x128xf32>,
    } else {
    }
    return
  }
  func.func @transform_0(%arg0: i32, %arg1: i32, %arg2: memref<1xi32, #tpu.memory_space<smem>>, %arg3: memref<1xi32, #tpu.memory_space<smem>>, %arg4: memref<1xi32, #tpu.memory_space<smem>>) -> (i32, i32) {
    %c1_i32 = arith.constant 1 : i32
    %0 = arith.muli %arg0, %c1_i32 : i32
    %1 = arith.addi %0, %arg1 : i32
    %2 = arith.index_cast %1 : i32 to index
    %3 = memref.load %arg3[%2] : memref<1xi32, #tpu.memory_space<smem>>
    %c1_i32_0 = arith.constant 1 : i32
    %4 = arith.muli %arg0, %c1_i32_0 : i32
    %5 = arith.addi %4, %arg1 : i32
    %6 = arith.index_cast %5 : i32 to index
    %7 = memref.load %arg4[%6] : memref<1xi32, #tpu.memory_space<smem>>
    %c0_i32 = arith.constant 0 : i32
    return %3, %7 : i32, i32
  }
  func.func @transform_1(%arg0: i32, %arg1: i32, %arg2: memref<1xi32, #tpu.memory_space<smem>>, %arg3: memref<1xi32, #tpu.memory_space<smem>>, %arg4: memref<1xi32, #tpu.memory_space<smem>>) -> (i32, i32) {
    %c0_i32 = arith.constant 0 : i32
    %c0_i32_0 = arith.constant 0 : i32
    %c0_i32_1 = arith.constant 0 : i32
    return %c0_i32, %c0_i32_0 : i32, i32
  }
  func.func @transform_2(%arg0: i32, %arg1: i32, %arg2: memref<1xi32, #tpu.memory_space<smem>>, %arg3: memref<1xi32, #tpu.memory_space<smem>>, %arg4: memref<1xi32, #tpu.memory_space<smem>>) -> (i32, i32) {
    %c0_i32 = arith.constant 0 : i32
    %c0_i32_0 = arith.constant 0 : i32
    %c0_i32_1 = arith.constant 0 : i32
    return %c0_i32, %c0_i32_0 : i32, i32
  }
  func.func @transform_3(%arg0: i32, %arg1: i32, %arg2: memref<1xi32, #tpu.memory_space<smem>>, %arg3: memref<1xi32, #tpu.memory_space<smem>>, %arg4: memref<1xi32, #tpu.memory_space<smem>>) -> (i32, i32) {
    %c0_i32 = arith.constant 0 : i32
    %c0_i32_0 = arith.constant 0 : i32
    %c0_i32_1 = arith.constant 0 : i32
    return %c0_i32, %c0_i32_0 : i32, i32
  }
  func.func @transform_4(%arg0: i32, %arg1: i32, %arg2: memref<1xi32, #tpu.memory_space<smem>>, %arg3: memref<1xi32, #tpu.memory_space<smem>>, %arg4: memref<1xi32, #tpu.memory_space<smem>>) -> (i32, i32) {
    %c0_i32 = arith.constant 0 : i32
    %c0_i32_0 = arith.constant 0 : i32
    return %arg0, %c0_i32 : i32, i32
  }
}

</mosaic_0001>

<bundles_post_ra>
// kernel: tpu_custom_call.1
= control target key start
LH: loop header
LB: loop body
LE: loop exit
PB: predicated region body
PF: predicated region fallthrough
CT: control target
= control target key end

     0   :  { %15 = vsyncpa [#allocation8], 0  ;;  %s838_s0 = inlined_call_operand.<no memory space> [shape: s32[1], index: 0, kind: input, shape index: {}]   ;;  %s839_s1 = inlined_call_operand.<no memory space> [shape: s32[1], index: 1, kind: input, shape index: {}]   ;;  %s840_s2 = inlined_call_operand.<no memory space> [shape: s32[1], index: 2, kind: input, shape index: {}]   ;;  %s841_s3 = inlined_call_operand.hbm [shape: s8[128,128], index: 3, kind: input, shape index: {}]   ;;  %s842_s4 = inlined_call_operand.hbm [shape: bf16[128,128], index: 4, kind: input, shape index: {}]   ;;  %s843_s5 = inlined_call_operand.hbm [shape: bf16[128,128], index: 5, kind: input, shape index: {}]   ;;  %s844_s6 = inlined_call_operand.vmem [shape: f32[1,128], index: 6, kind: input, shape index: {}]   ;;  %s845_s7 = inlined_call_operand.hbm [shape: f32[128,128], index: 7, kind: output, shape index: {}]  }
   0x1   :  { %16 = vsyncpa [#allocation11], 0  ;;  %s42_s26 = sshll.u32 %s842_s4, 4  ;;  %s43_s26 = int_to_ptr.hbm [resolvable:$true] %s42_s26 }
   0x2   :  { %17 = vsyncpa [#allocation9], 0  ;;  %s747_s27 = smov [#allocation10]   ;;  %s504_s8 = sshll.u32 %s839_s1, 2 }
   0x3   :  { %s44_s28 = sshll.u32 %s747_s27, 4  ;;  %s748_s9 = smov 64   ;;  %s45_s28 = int_to_ptr.vmem [resolvable:$true] %s44_s28 }
   0x4   :  { %s749_s10 = smov 4   ;;  %s26_s13 = sadd.s32 %s504_s8, %s840_s2 }
   0x5   :  { %50 = dma.hbm_to_vmem [thread:$0]  %s43_s26, 1024, %s45_s28, [#allocation11], %s748_s9, %s748_s9, %s749_s10  }
   0x6   :  { %s505_s4 = sshll.u32 %s26_s13, 3  ;;  %s750_s14 = smov [#allocation7]  }
   0x7   :  { %s31_s15 = sshll.u32 %s750_s14, 4  ;;  %s28_s18 = scalar_lea.hbm %s841_s3, %s505_s4  ;;  %s32_s15 = int_to_ptr.vmem [resolvable:$true] %s31_s15 }
   0x8   :  { %s29_s19 = sshll.u32 %s28_s18, 4  ;;  %s673_s23 = scalar_lea.hbm %s841_s3, 32  ;;  %s30_s19 = int_to_ptr.hbm [resolvable:$true] %s29_s19 }
   0x9   :  { %s669_s1 = sshra.s32 %s30_s19, 4  ;;  %s670_s1 = int_to_ptr.hbm [resolvable:$true] %s669_s1 }
   0xa   :  { %s671_s20 = scalar_lea.hbm %s670_s1, 32  ;;  %p674_p1 = scmp.lt.s32.totalorder %s670_s1, %s841_s3 }
   0xb   :  { %p672_p0 = scmp.ne.s32.totalorder %s670_s1, %s671_s20  ;;  %p675_p2 = scmp.lt.s32.totalorder %s673_s23, %s671_s20 }
   0xd   :  { %p676_p3 = por %p675_p2, %p674_p1 }
   0xf   :  { %p677_p4 = pnand %p676_p3, %p672_p0 }
  0x11   :  { %680 = shalt.err (!%p677_p4)
}
  0x12   :  { %s751_s25 = smov 128   ;;  %s752_s26 = smov 8  }
  0x13   :  { %37 = dma.hbm_to_vmem [thread:$0]  %s30_s19, 512, %s32_s15, [#allocation8], %s751_s25, %s751_s25, %s752_s26  }
  0x14   :  { %s55_s29 = sshll.u32 %s843_s5, 4  ;;  %s753_s30 = smov [#allocation12]   ;;  %s56_s29 = int_to_ptr.hbm [resolvable:$true] %s55_s29 }
  0x15   :  { %s57_s8 = sshll.u32 %s753_s30, 4  ;;  %s58_s8 = int_to_ptr.vmem [resolvable:$true] %s57_s8 }
  0x16   :  { %63 = dma.hbm_to_vmem [thread:$0]  %s56_s29, 1024, %s58_s8, [#allocation11], %s748_s9, %s748_s9, %s749_s10  }
  0x17   :  { %741 = dma.done.wait [#allocation8], 512  }
  0x18   :  { %742 = vsyncadd [#allocation8], 4294966784 }
  0x19   :  { %743 = dma.done.wait [#allocation11], 2048  }
  0x1a   :  { %744 = vsyncadd [#allocation11], 4294965248  ;;  %v754_v0 = vmov 0.0   ;;  %p506_p5 = scmp.ne.s32.totalorder %s838_s0, 1 }
  0x1b   :  { %86 = vst [vmem:[#allocation2 + $0x30] sm:$0xff] %v754_v0 }
  0x1c   :  { %87 = vst [vmem:[#allocation2] sm:$0xff] %v754_v0 }
  0x1d   :  { %88 = vst [vmem:[#allocation2 + $0x58] sm:$0xff] %v754_v0 }
  0x1e   :  { %89 = vst [vmem:[#allocation2 + $0x18] sm:$0xff] %v754_v0 }
  0x1f   :  { %90 = vst [vmem:[#allocation2 + $0x50] sm:$0xff] %v754_v0 }
  0x20   :  { %91 = vst [vmem:[#allocation2 + $0x68] sm:$0xff] %v754_v0 }
  0x21   :  { %92 = vst [vmem:[#allocation2 + $0x8] sm:$0xff] %v754_v0 }
  0x22   :  { %93 = vst [vmem:[#allocation2 + $0x48] sm:$0xff] %v754_v0 }
  0x23   :  { %94 = vst [vmem:[#allocation2 + $0x40] sm:$0xff] %v754_v0 }
  0x24   :  { %95 = vst [vmem:[#allocation2 + $0x20] sm:$0xff] %v754_v0 }
  0x25   :  { %96 = vst [vmem:[#allocation2 + $0x10] sm:$0xff] %v754_v0 }
  0x26   :  { %97 = vst [vmem:[#allocation2 + $0x38] sm:$0xff] %v754_v0  ;;  %107 = sbr.rel (%p506_p5) target bundleno = 236 (0xec), region = 37 }
  0x27   :  { %98 = vst [vmem:[#allocation2 + $0x60] sm:$0xff] %v754_v0 }
  0x28   :  { %99 = vst [vmem:[#allocation2 + $0x70] sm:$0xff] %v754_v0 }
  0x29   :  { %100 = vst [vmem:[#allocation2 + $0x78] sm:$0xff] %v754_v0 }
  0x2a   :  { %101 = vst [vmem:[#allocation2 + $0x28] sm:$0xff] %v754_v0 }
  0x2b   :  { %v578_v1 = vld [vmem:[#allocation10 + $0x38] sm:$0xff]  ;;  %v577_v2 = vld [vmem:[#allocation10 + $0x30] sm:$0xff]  ;;  %v576_v3 = vld [vmem:[#allocation10 + $0x28] sm:$0xff] }
  0x2c   :  { %237 = vmatpush.bf16.msra.mxu0 %v578_v1  ;;  %587 = vmatpush.bf16.msra.mxu1 %v578_v1  ;;  %v575_v4 = vld [vmem:[#allocation10 + $0x20] sm:$0xff]  ;;  %v574_v5 = vld [vmem:[#allocation10 + $0x18] sm:$0xff]  ;;  %v573_v6 = vld [vmem:[#allocation10 + $0x10] sm:$0xff] }
  0x2d   :  { %588 = vmatpush.bf16.msra.mxu2 %v578_v1  ;;  %589 = vmatpush.bf16.msra.mxu3 %v578_v1  ;;  %v108_v7 = vld [vmem:[#allocation7] sm:$0xff]  ;;  %v109_v8 = vld [vmem:[#allocation7 + $0x8] sm:$0xff]  ;;  %v110_v9 = vld [vmem:[#allocation7 + $0x10] sm:$0xff] }
  0x2e   :  { %v111_v10 = vld [vmem:[#allocation7 + $0x18] sm:$0xff]  ;;  %v112_v11 = vunpack.c.0.s8 %v108_v7  ;;  %v113_v12 = vunpack.c.1.s8 %v108_v7  ;;  %v116_v13 = vunpack.c.0.s8 %v109_v8  ;;  %v117_v14 = vunpack.c.1.s8 %v109_v8  ;;  %v572_v15 = vld [vmem:[#allocation10 + $0x8] sm:$0xff]  ;;  %v571_v24 = vld [vmem:[#allocation10] sm:$0xff] }
  0x2f   :  { %v120_v16 = vunpack.c.0.s8 %v110_v9  ;;  %v121_v17 = vunpack.c.1.s8 %v110_v9  ;;  %v124_v18 = vunpack.c.0.s8 %v111_v10  ;;  %v125_v19 = vunpack.c.1.s8 %v111_v10  ;;  %v173_v53 = vld [vmem:[#allocation2 + $0x30] sm:$0xff]  ;;  %v181_v59 = vld [vmem:[#allocation2 + $0x40] sm:$0xff]  ;;  %v178_v62 = vld [vmem:[#allocation2 + $0x68] sm:$0xff] }
  0x30   :  { %238 = vmatpush.bf16.msra.mxu0 %v577_v2  ;;  %590 = vmatpush.bf16.msra.mxu1 %v577_v2  ;;  %v128_v20 = vcvt.s32.f32 %v112_v11  ;;  %v129_v21 = vcvt.s32.f32 %v113_v12  ;;  %v132_v22 = vcvt.s32.f32 %v116_v13  ;;  %v133_v23 = vcvt.s32.f32 %v117_v14  ;;  %v177_v54 = vld [vmem:[#allocation2 + $0x50] sm:$0xff]  ;;  %v185_v60 = vld [vmem:[#allocation2 + $0x60] sm:$0xff] }
  0x31   :  { %591 = vmatpush.bf16.msra.mxu2 %v577_v2  ;;  %592 = vmatpush.bf16.msra.mxu3 %v577_v2  ;;  %v136_v25 = vcvt.s32.f32 %v120_v16  ;;  %v137_v26 = vcvt.s32.f32 %v121_v17  ;;  %v140_v27 = vcvt.s32.f32 %v124_v18  ;;  %v141_v28 = vcvt.s32.f32 %v125_v19  ;;  %v174_v61 = vld [vmem:[#allocation2] sm:$0xff]  ;;  %v183_v19 = vld [vmem:[#allocation2 + $0x10] sm:$0xff] }
  0x32   :  { %v144_v29 = vpack.c.bf16 %v129_v21, %v128_v20  ;;  %v146_v30 = vpack.c.bf16 %v133_v23, %v132_v22  ;;  %v114_v33 = vunpack.c.2.s8 %v108_v7  ;;  %v115_v34 = vunpack.c.3.s8 %v108_v7  ;;  %v182_v7 = vld [vmem:[#allocation2 + $0x20] sm:$0xff]  ;;  %v187_v20 = vld [vmem:[#allocation2 + $0x78] sm:$0xff]  ;;  %v180_v22 = vld [vmem:[#allocation2 + $0x48] sm:$0xff] }
  0x33   :  { %v148_v31 = vpack.c.bf16 %v137_v26, %v136_v25  ;;  %v150_v32 = vpack.c.bf16 %v141_v28, %v140_v27  ;;  %v118_v35 = vunpack.c.2.s8 %v109_v8  ;;  %v119_v36 = vunpack.c.3.s8 %v109_v8  ;;  %v186_v8 = vld [vmem:[#allocation2 + $0x70] sm:$0xff]  ;;  %v176_v21 = vld [vmem:[#allocation2 + $0x18] sm:$0xff] }
  0x34   :  { %239 = vmatpush.bf16.msra.mxu0 %v576_v3  ;;  %593 = vmatpush.bf16.msra.mxu1 %v576_v3  ;;  %v122_v37 = vunpack.c.2.s8 %v110_v9  ;;  %v123_v38 = vunpack.c.3.s8 %v110_v9  ;;  %v126_v39 = vunpack.c.2.s8 %v111_v10  ;;  %v127_v40 = vunpack.c.3.s8 %v111_v10  ;;  %v175_v9 = vld [vmem:[#allocation2 + $0x58] sm:$0xff]  ;;  %v179_v10 = vld [vmem:[#allocation2 + $0x8] sm:$0xff] }
  0x35   :  { %594 = vmatpush.bf16.msra.mxu2 %v576_v3  ;;  %595 = vmatpush.bf16.msra.mxu3 %v576_v3  ;;  %v130_v41 = vcvt.s32.f32 %v114_v33  ;;  %v131_v42 = vcvt.s32.f32 %v115_v34  ;;  %v134_v43 = vcvt.s32.f32 %v118_v35  ;;  %v135_v44 = vcvt.s32.f32 %v119_v36 }
  0x36   :  { %v138_v45 = vcvt.s32.f32 %v122_v37  ;;  %v139_v46 = vcvt.s32.f32 %v123_v38  ;;  %v142_v47 = vcvt.s32.f32 %v126_v39  ;;  %v143_v48 = vcvt.s32.f32 %v127_v40 }
  0x37   :  { %v145_v49 = vpack.c.bf16 %v131_v42, %v130_v41  ;;  %v147_v50 = vpack.c.bf16 %v135_v44, %v134_v43 }
  0x38   :  { %240 = vmatpush.bf16.msra.mxu0 %v575_v4  ;;  %596 = vmatpush.bf16.msra.mxu1 %v575_v4  ;;  %v149_v51 = vpack.c.bf16 %v139_v46, %v138_v45  ;;  %v151_v52 = vpack.c.bf16 %v143_v48, %v142_v47 }
  0x39   :  { %597 = vmatpush.bf16.msra.mxu2 %v575_v4  ;;  %598 = vmatpush.bf16.msra.mxu3 %v575_v4 }
  0x3c   :  { %241 = vmatpush.bf16.msra.mxu0 %v574_v5  ;;  %599 = vmatpush.bf16.msra.mxu1 %v574_v5 }
  0x3d   :  { %600 = vmatpush.bf16.msra.mxu2 %v574_v5  ;;  %601 = vmatpush.bf16.msra.mxu3 %v574_v5 }
  0x40   :  { %242 = vmatpush.bf16.msra.mxu0 %v573_v6  ;;  %602 = vmatpush.bf16.msra.mxu1 %v573_v6 }
  0x41   :  { %603 = vmatpush.bf16.msra.mxu2 %v573_v6  ;;  %604 = vmatpush.bf16.msra.mxu3 %v573_v6 }
  0x44   :  { %243 = vmatpush.bf16.msra.mxu0 %v572_v15  ;;  %605 = vmatpush.bf16.msra.mxu1 %v572_v15 }
  0x45   :  { %606 = vmatpush.bf16.msra.mxu2 %v572_v15  ;;  %607 = vmatpush.bf16.msra.mxu3 %v572_v15 }
  0x48   :  { %244 = vmatpush.bf16.msra.mxu0 %v571_v24  ;;  %608 = vmatpush.bf16.msra.mxu1 %v571_v24 }
  0x49   :  { %609 = vmatpush.bf16.msra.mxu2 %v571_v24  ;;  %610 = vmatpush.bf16.msra.mxu3 %v571_v24 }
  0x4b   :  { %245 = vmatmul.bf16.vlgmr.msra.gmra.mxu0 %v144_v29  ;;  %255 = vmatmul.bf16.vlgmr.msra.gmra.mxu1 %v146_v30 }
  0x4c   :  { %265 = vmatmul.bf16.vlgmr.msra.gmra.mxu2 %v148_v31  ;;  %275 = vmatmul.bf16.vlgmr.msra.gmra.mxu3 %v150_v32  ;;  %v184_v31 = vld [vmem:[#allocation2 + $0x38] sm:$0xff]  ;;  %v188_v32 = vld [vmem:[#allocation2 + $0x28] sm:$0xff] }
  0x5b   :  { %250 = vmatmul.bf16.gmra.mxu0 %v145_v49  ;;  %260 = vmatmul.bf16.gmra.mxu1 %v147_v50 }
  0x5c   :  { %270 = vmatmul.bf16.gmra.mxu2 %v149_v51  ;;  %280 = vmatmul.bf16.gmra.mxu3 %v151_v52 }
  0xc8   :  { %v246_v55 = vpop.f32.mrf.mxu0  ;;  %v256_v56 = vpop.f32.mrf.mxu1 }
  0xc9   :  { %v286_v57 = vadd.f32 %v246_v55, %v173_v53  ;;  %v290_v58 = vadd.f32 %v256_v56, %v177_v54 }
  0xcb   :  { %302 = vst [vmem:[#allocation2 + $0x30] sm:$0xff] %v286_v57 }
  0xcc   :  { %306 = vst [vmem:[#allocation2 + $0x50] sm:$0xff] %v290_v58 }
  0xcf   :  { %v266_v63 = vpop.f32.mrf.mxu2  ;;  %v276_v0 = vpop.f32.mrf.mxu3 }
  0xd0   :  { %v294_v1 = vadd.f32 %v266_v63, %v181_v59  ;;  %v298_v2 = vadd.f32 %v276_v0, %v185_v60  ;;  %v248_v3 = vpop.f32.mrf.mxu0  ;;  %v258_v4 = vpop.f32.mrf.mxu1 }
  0xd1   :  { %v287_v5 = vadd.f32 %v248_v3, %v174_v61  ;;  %v291_v6 = vadd.f32 %v258_v4, %v178_v62 }
  0xd2   :  { %310 = vst [vmem:[#allocation2 + $0x40] sm:$0xff] %v294_v1 }
  0xd3   :  { %314 = vst [vmem:[#allocation2 + $0x60] sm:$0xff] %v298_v2 }
  0xd4   :  { %303 = vst [vmem:[#allocation2] sm:$0xff] %v287_v5 }
  0xd5   :  { %307 = vst [vmem:[#allocation2 + $0x68] sm:$0xff] %v291_v6 }
  0xd7   :  { %v268_v11 = vpop.f32.mrf.mxu2  ;;  %v278_v12 = vpop.f32.mrf.mxu3 }
  0xd8   :  { %v295_v13 = vadd.f32 %v268_v11, %v182_v7  ;;  %v299_v14 = vadd.f32 %v278_v12, %v186_v8  ;;  %v251_v15 = vpop.f32.mrf.mxu0  ;;  %v261_v16 = vpop.f32.mrf.mxu1 }
  0xd9   :  { %v288_v17 = vadd.f32 %v251_v15, %v175_v9  ;;  %v292_v18 = vadd.f32 %v261_v16, %v179_v10 }
  0xda   :  { %311 = vst [vmem:[#allocation2 + $0x20] sm:$0xff] %v295_v13 }
  0xdb   :  { %315 = vst [vmem:[#allocation2 + $0x70] sm:$0xff] %v299_v14 }
  0xdc   :  { %304 = vst [vmem:[#allocation2 + $0x58] sm:$0xff] %v288_v17 }
  0xdd   :  { %308 = vst [vmem:[#allocation2 + $0x8] sm:$0xff] %v292_v18 }
  0xdf   :  { %v271_v23 = vpop.f32.mrf.mxu2  ;;  %v281_v24 = vpop.f32.mrf.mxu3 }
  0xe0   :  { %v296_v25 = vadd.f32 %v271_v23, %v183_v19  ;;  %v300_v26 = vadd.f32 %v281_v24, %v187_v20  ;;  %v253_v27 = vpop.f32.mrf.mxu0  ;;  %v263_v28 = vpop.f32.mrf.mxu1 }
  0xe1   :  { %v289_v29 = vadd.f32 %v253_v27, %v176_v21  ;;  %v293_v30 = vadd.f32 %v263_v28, %v180_v22 }
  0xe2   :  { %312 = vst [vmem:[#allocation2 + $0x10] sm:$0xff] %v296_v25 }
  0xe3   :  { %316 = vst [vmem:[#allocation2 + $0x78] sm:$0xff] %v300_v26 }
  0xe4   :  { %305 = vst [vmem:[#allocation2 + $0x18] sm:$0xff] %v289_v29 }
  0xe5   :  { %309 = vst [vmem:[#allocation2 + $0x48] sm:$0xff] %v293_v30 }
  0xe7   :  { %v273_v33 = vpop.f32.mrf.mxu2  ;;  %v283_v34 = vpop.f32.mrf.mxu3 }
  0xe8   :  { %v297_v35 = vadd.f32 %v273_v33, %v184_v31  ;;  %v301_v36 = vadd.f32 %v283_v34, %v188_v32 }
  0xea   :  { %313 = vst [vmem:[#allocation2 + $0x38] sm:$0xff] %v297_v35 }
  0xeb   :  { %317 = vst [vmem:[#allocation2 + $0x28] sm:$0xff] %v301_v36 }
  0xec PF:  { %v586_v37 = vld [vmem:[#allocation12 + $0x38] sm:$0xff]  ;;  %v585_v38 = vld [vmem:[#allocation12 + $0x30] sm:$0xff]  ;;  %v584_v39 = vld [vmem:[#allocation12 + $0x28] sm:$0xff]  ;;  %s484_s13 = sshll.u32 %s845_s7, 4  ;;  %s485_s13 = int_to_ptr.hbm [resolvable:$true] %s484_s13 }
  0xed   :  { %413 = vmatpush.bf16.msra.mxu0 %v586_v37  ;;  %611 = vmatpush.bf16.msra.mxu1 %v586_v37  ;;  %v583_v40 = vld [vmem:[#allocation12 + $0x20] sm:$0xff]  ;;  %v582_v41 = vld [vmem:[#allocation12 + $0x18] sm:$0xff]  ;;  %v581_v42 = vld [vmem:[#allocation12 + $0x10] sm:$0xff] }
  0xee   :  { %612 = vmatpush.bf16.msra.mxu2 %v586_v37  ;;  %613 = vmatpush.bf16.msra.mxu3 %v586_v37  ;;  %v580_v43 = vld [vmem:[#allocation12 + $0x8] sm:$0xff]  ;;  %v579_v44 = vld [vmem:[#allocation12] sm:$0xff]  ;;  %v321_v45 = vld [vmem:[#allocation2 + $0x30] sm:$0xff] }
  0xef   :  { %v322_v46 = vld [vmem:[#allocation2] sm:$0xff]  ;;  %v325_v47 = vld [vmem:[#allocation2 + $0x50] sm:$0xff]  ;;  %v326_v48 = vld [vmem:[#allocation2 + $0x68] sm:$0xff] }
  0xf0   :  { %v329_v49 = vld [vmem:[#allocation2 + $0x40] sm:$0xff]  ;;  %v334_v52 = vld [vmem:[#allocation2 + $0x70] sm:$0xff]  ;;  %v337_v53 = vpack.c.bf16 %v322_v46, %v321_v45  ;;  %v339_v54 = vpack.c.bf16 %v326_v48, %v325_v47  ;;  %v323_v57 = vld [vmem:[#allocation2 + $0x58] sm:$0xff] }
  0xf1   :  { %414 = vmatpush.bf16.msra.mxu0 %v585_v38  ;;  %614 = vmatpush.bf16.msra.mxu1 %v585_v38  ;;  %v330_v50 = vld [vmem:[#allocation2 + $0x20] sm:$0xff]  ;;  %v324_v58 = vld [vmem:[#allocation2 + $0x18] sm:$0xff]  ;;  %v327_v59 = vld [vmem:[#allocation2 + $0x8] sm:$0xff] }
  0xf2   :  { %615 = vmatpush.bf16.msra.mxu2 %v585_v38  ;;  %616 = vmatpush.bf16.msra.mxu3 %v585_v38  ;;  %v333_v51 = vld [vmem:[#allocation2 + $0x60] sm:$0xff]  ;;  %v341_v55 = vpack.c.bf16 %v330_v50, %v329_v49  ;;  %v328_v60 = vld [vmem:[#allocation2 + $0x48] sm:$0xff]  ;;  %v331_v61 = vld [vmem:[#allocation2 + $0x10] sm:$0xff]  ;;  %v338_v1 = vpack.c.bf16 %v324_v58, %v323_v57 }
  0xf3   :  { %v343_v56 = vpack.c.bf16 %v334_v52, %v333_v51  ;;  %v332_v62 = vld [vmem:[#allocation2 + $0x38] sm:$0xff]  ;;  %v336_v0 = vld [vmem:[#allocation2 + $0x28] sm:$0xff]  ;;  %v340_v2 = vpack.c.bf16 %v328_v60, %v327_v59  ;;  %v644_v5 = vld [vmem:[%s844_s6] ss:$0 sm:$0xff]  ;;  %s755_s6 = smov [#allocation13]  }
  0xf4   :  { %v335_v63 = vld [vmem:[#allocation2 + $0x78] sm:$0xff]  ;;  %v342_v3 = vpack.c.bf16 %v332_v62, %v331_v61  ;;  %s482_s10 = sshll.u32 %s755_s6, 4  ;;  %s483_s10 = int_to_ptr.vmem [resolvable:$true] %s482_s10 }
  0xf5   :  { %415 = vmatpush.bf16.msra.mxu0 %v584_v39  ;;  %617 = vmatpush.bf16.msra.mxu1 %v584_v39  ;;  %v344_v4 = vpack.c.bf16 %v336_v0, %v335_v63 }
  0xf6   :  { %618 = vmatpush.bf16.msra.mxu2 %v584_v39  ;;  %619 = vmatpush.bf16.msra.mxu3 %v584_v39 }
  0xf9   :  { %416 = vmatpush.bf16.msra.mxu0 %v583_v40  ;;  %620 = vmatpush.bf16.msra.mxu1 %v583_v40 }
  0xfa   :  { %621 = vmatpush.bf16.msra.mxu2 %v583_v40  ;;  %622 = vmatpush.bf16.msra.mxu3 %v583_v40 }
  0xfd   :  { %417 = vmatpush.bf16.msra.mxu0 %v582_v41  ;;  %623 = vmatpush.bf16.msra.mxu1 %v582_v41 }
  0xfe   :  { %624 = vmatpush.bf16.msra.mxu2 %v582_v41  ;;  %625 = vmatpush.bf16.msra.mxu3 %v582_v41 }
 0x101   :  { %418 = vmatpush.bf16.msra.mxu0 %v581_v42  ;;  %626 = vmatpush.bf16.msra.mxu1 %v581_v42 }
 0x102   :  { %627 = vmatpush.bf16.msra.mxu2 %v581_v42  ;;  %628 = vmatpush.bf16.msra.mxu3 %v581_v42 }
 0x105   :  { %419 = vmatpush.bf16.msra.mxu0 %v580_v43  ;;  %629 = vmatpush.bf16.msra.mxu1 %v580_v43 }
 0x106   :  { %630 = vmatpush.bf16.msra.mxu2 %v580_v43  ;;  %631 = vmatpush.bf16.msra.mxu3 %v580_v43 }
 0x109   :  { %420 = vmatpush.bf16.msra.mxu0 %v579_v44  ;;  %632 = vmatpush.bf16.msra.mxu1 %v579_v44 }
 0x10a   :  { %633 = vmatpush.bf16.msra.mxu2 %v579_v44  ;;  %634 = vmatpush.bf16.msra.mxu3 %v579_v44 }
 0x10c   :  { %421 = vmatmul.bf16.vlgmr.msra.gmra.mxu0 %v337_v53  ;;  %431 = vmatmul.bf16.vlgmr.msra.gmra.mxu1 %v339_v54 }
 0x10d   :  { %441 = vmatmul.bf16.vlgmr.msra.gmra.mxu2 %v341_v55  ;;  %451 = vmatmul.bf16.vlgmr.msra.gmra.mxu3 %v343_v56 }
 0x11c   :  { %426 = vmatmul.bf16.gmra.mxu0 %v338_v1  ;;  %436 = vmatmul.bf16.gmra.mxu1 %v340_v2 }
 0x11d   :  { %446 = vmatmul.bf16.gmra.mxu2 %v342_v3  ;;  %456 = vmatmul.bf16.gmra.mxu3 %v344_v4 }
 0x189   :  { %v422_v6 = vpop.f32.mrf.mxu0  ;;  %v432_v7 = vpop.f32.mrf.mxu1 }
 0x18a   :  { %v423_v8 = vadd.f32 %v644_v5, %v422_v6  ;;  %v433_v9 = vadd.f32 %v644_v5, %v432_v7 }
 0x18c   :  { %462 = vst [vmem:[#allocation13] sm:$0xff] %v423_v8 }
 0x18d   :  { %466 = vst [vmem:[#allocation13 + $0x20] sm:$0xff] %v433_v9 }
 0x190   :  { %v442_v10 = vpop.f32.mrf.mxu2  ;;  %v452_v11 = vpop.f32.mrf.mxu3 }
 0x191   :  { %v443_v12 = vadd.f32 %v644_v5, %v442_v10  ;;  %v453_v13 = vadd.f32 %v644_v5, %v452_v11  ;;  %v424_v14 = vpop.f32.mrf.mxu0  ;;  %v434_v15 = vpop.f32.mrf.mxu1 }
 0x192   :  { %v425_v16 = vadd.f32 %v644_v5, %v424_v14  ;;  %v435_v17 = vadd.f32 %v644_v5, %v434_v15 }
 0x193   :  { %470 = vst [vmem:[#allocation13 + $0x40] sm:$0xff] %v443_v12 }
 0x194   :  { %474 = vst [vmem:[#allocation13 + $0x60] sm:$0xff] %v453_v13 }
 0x195   :  { %463 = vst [vmem:[#allocation13 + $0x8] sm:$0xff] %v425_v16 }
 0x196   :  { %467 = vst [vmem:[#allocation13 + $0x28] sm:$0xff] %v435_v17 }
 0x198   :  { %v444_v18 = vpop.f32.mrf.mxu2  ;;  %v454_v19 = vpop.f32.mrf.mxu3 }
 0x199   :  { %v445_v20 = vadd.f32 %v644_v5, %v444_v18  ;;  %v455_v21 = vadd.f32 %v644_v5, %v454_v19  ;;  %v427_v22 = vpop.f32.mrf.mxu0  ;;  %v437_v23 = vpop.f32.mrf.mxu1 }
 0x19a   :  { %v428_v24 = vadd.f32 %v644_v5, %v427_v22  ;;  %v438_v25 = vadd.f32 %v644_v5, %v437_v23 }
 0x19b   :  { %471 = vst [vmem:[#allocation13 + $0x48] sm:$0xff] %v445_v20 }
 0x19c   :  { %475 = vst [vmem:[#allocation13 + $0x68] sm:$0xff] %v455_v21 }
 0x19d   :  { %464 = vst [vmem:[#allocation13 + $0x10] sm:$0xff] %v428_v24 }
 0x19e   :  { %468 = vst [vmem:[#allocation13 + $0x30] sm:$0xff] %v438_v25 }
 0x1a0   :  { %v447_v26 = vpop.f32.mrf.mxu2  ;;  %v457_v27 = vpop.f32.mrf.mxu3 }
 0x1a1   :  { %v448_v28 = vadd.f32 %v644_v5, %v447_v26  ;;  %v458_v29 = vadd.f32 %v644_v5, %v457_v27  ;;  %v429_v30 = vpop.f32.mrf.mxu0  ;;  %v439_v31 = vpop.f32.mrf.mxu1 }
 0x1a2   :  { %v430_v32 = vadd.f32 %v644_v5, %v429_v30  ;;  %v440_v33 = vadd.f32 %v644_v5, %v439_v31 }
 0x1a3   :  { %472 = vst [vmem:[#allocation13 + $0x50] sm:$0xff] %v448_v28 }
 0x1a4   :  { %476 = vst [vmem:[#allocation13 + $0x70] sm:$0xff] %v458_v29 }
 0x1a5   :  { %465 = vst [vmem:[#allocation13 + $0x18] sm:$0xff] %v430_v32 }
 0x1a6   :  { %469 = vst [vmem:[#allocation13 + $0x38] sm:$0xff] %v440_v33 }
 0x1a8   :  { %v449_v34 = vpop.f32.mrf.mxu2  ;;  %v459_v35 = vpop.f32.mrf.mxu3 }
 0x1a9   :  { %v450_v36 = vadd.f32 %v644_v5, %v449_v34  ;;  %v460_v37 = vadd.f32 %v644_v5, %v459_v35 }
 0x1ab   :  { %473 = vst [vmem:[#allocation13 + $0x58] sm:$0xff] %v450_v36 }
 0x1ac   :  { %477 = vst [vmem:[#allocation13 + $0x78] sm:$0xff] %v460_v37 }
 0x1ad   :  { %490 = dma.vmem_to_hbm [thread:$0]  %s483_s10, 2048, %s485_s13, [#allocation9], %s751_s25, %s751_s25, %s752_s26  }
 0x1ae   :  { %745 = dma.done.wait [#allocation9], 2048  }
 0x1af   :  { %746 = vsyncadd [#allocation9], 4294965248 }
 0x1b0   :  { %495 = vsyncpa [#allocation8], 1 }
 0x1b1   :  { %496 = vsyncpa [#allocation11], 1 }
 0x1b2   :  { %497 = vsyncpa [#allocation9], 1 }

</bundles_post_ra>
